<compile_context>
chip_gen: v7x
topology: tpu7x:2x2x1
jax: 0.10.0
libtpu: 0.0.40
codegen_flags: <defaults>
</compile_context>

<pallas_src>
import jax
import jax.numpy as jnp
from jax.experimental import pallas as pl
from jax.experimental.pallas import tpu as pltpu


def gcn_kernel(ahat_ref, x_ref, r_ref, w1_ref, b1_ref, w2_ref, b2_ref, out_ref):
    ahat = ahat_ref[0]                                  # (Np, Np)
    x = x_ref[0]                                        # (Np, Fp)

    # Layer 1: GraphConv(in_feats -> h_feats) + ReLU   (small-dim contraction first)
    xw = jnp.dot(x, w1_ref[...], preferred_element_type=jnp.float32)       # (Np, Hp)
    h1 = jnp.dot(ahat, xw, preferred_element_type=jnp.float32) + b1_ref[...]
    h1 = jnp.maximum(h1, 0.0)                                              # (Np, Hp)

    # Layer 2 + folded mean_nodes readout:
    #   mean_rows(Ahat @ (H1@W2) + b2) == (mean_rows(Ahat) @ H1) @ W2 + b2
    # r is stored as 8 sublanes (row 0 real, rows 1-7 zero) so every matmul and the
    # final store are clean (8,128)-tile shapes.
    rh = jnp.dot(r_ref[0], h1, preferred_element_type=jnp.float32)         # (8, Hp)
    out_ref[0] = (
        jnp.dot(rh, w2_ref[...], preferred_element_type=jnp.float32) + b2_ref[...]
    )                                                                      # (8, Cp)


def _round_up(v, m):
    return ((v + m - 1) // m) * m


def _pad_to(a, shape):
    return jnp.pad(a, [(0, t - s) for s, t in zip(a.shape, shape)])


def gcn_forward(ahat, x, w1, b1, w2, b2):
    """ahat: (B,N,N) normalized adjacency; x: (B,N,Fin); weights shared across graphs.
    Returns (B, num_classes) graph-level readout (== dgl.mean_nodes per graph)."""
    B, N, _ = ahat.shape
    Fi = x.shape[-1]
    H = w1.shape[1]
    C = w2.shape[1]

    # Lane-dense padding (last dims -> 128); node dim also 128 (it is both a lane
    # dim of Ahat and the MXU contraction dim of Ahat @ XW).
    Np = _round_up(N, 128)
    Fp = _round_up(Fi, 128)
    Hp = _round_up(H, 128)
    Cp = _round_up(C, 128)

    ahat_p = _pad_to(ahat, (B, Np, Np))
    x_p = _pad_to(x, (B, Np, Fp))
    w1_p = _pad_to(w1, (Fp, Hp))
    b1_p = _pad_to(b1.reshape(1, H), (1, Hp))
    w2_p = _pad_to(w2, (Hp, Cp))
    b2_p = _pad_to(b2.reshape(1, C), (1, Cp))

    # Folded readout row vector: r[j] = (1/N) * sum_i Ahat[i, j], padded with zeros
    # (zero cols ensure padded node rows never contribute). Stored as 8 sublanes
    # (row 0 real) so every downstream tile is a clean (8,128) vreg shape.
    r = jnp.mean(ahat, axis=1)                           # (B, N), mean over node rows i
    r_p = jnp.zeros((B, 8, Np), jnp.float32).at[:, 0, :N].set(r)

    out_p = pl.pallas_call(
        gcn_kernel,
        out_shape=jax.ShapeDtypeStruct((B, 8, Cp), jnp.float32),
        grid=(B,),
        in_specs=[
            pl.BlockSpec((1, Np, Np), lambda b: (b, 0, 0)),   # Ahat  (per graph)
            pl.BlockSpec((1, Np, Fp), lambda b: (b, 0, 0)),   # X     (per graph)
            pl.BlockSpec((1, 8, Np), lambda b: (b, 0, 0)),    # r     (per graph)
            pl.BlockSpec((Fp, Hp), lambda b: (0, 0)),         # W1    (shared / resident)
            pl.BlockSpec((1, Hp), lambda b: (0, 0)),          # b1    (shared / resident)
            pl.BlockSpec((Hp, Cp), lambda b: (0, 0)),         # W2    (shared / resident)
            pl.BlockSpec((1, Cp), lambda b: (0, 0)),          # b2    (shared / resident)
        ],
        out_specs=pl.BlockSpec((1, 8, Cp), lambda b: (b, 0, 0)),
        compiler_params=pltpu.CompilerParams(
            dimension_semantics=("parallel",)),               # 2x on v7x (2 TCs)
    )(ahat_p, x_p, r_p, w1_p, b1_p, w2_p, b2_p)

    return out_p[:, 0, :C]                                    # strip padding


def build_normalized_adjacency(key, n):
    """Deterministic random undirected graph; Ahat = D_in^{-1/2} A D_out^{-1/2}."""
    probs = jax.random.uniform(key, (n, n))
    a = (probs + probs.T > 1.0).astype(jnp.float32)
    a = a * (1.0 - jnp.eye(n, dtype=jnp.float32))             # no self loops
    in_deg = jnp.clip(jnp.sum(a, axis=1), 1.0, None)
    out_deg = jnp.clip(jnp.sum(a, axis=0), 1.0, None)
    return (in_deg[:, None] ** -0.5) * a * (out_deg[None, :] ** -0.5)


if __name__ == "__main__":
    key = jax.random.PRNGKey(0)
    k_adj, k_x, k_w1, k_w2 = jax.random.split(key, 4)

    B = 8            # batch of graphs amortized over one pallas_call
    N = 16           # nodes per graph
    IN_FEATS = 8
    H_FEATS = 32
    NUM_CLASSES = 4

    ahat = jax.vmap(lambda k: build_normalized_adjacency(k, N))(jax.random.split(k_adj, B))
    x = jax.random.normal(k_x, (B, N, IN_FEATS), dtype=jnp.float32)

    def xavier_uniform(k, fan_in, fan_out):
        limit = (6.0 / (fan_in + fan_out)) ** 0.5
        return jax.random.uniform(k, (fan_in, fan_out), jnp.float32, -limit, limit)

    w1 = xavier_uniform(k_w1, IN_FEATS, H_FEATS)
    b1 = jnp.zeros((H_FEATS,), dtype=jnp.float32)
    w2 = xavier_uniform(k_w2, H_FEATS, NUM_CLASSES)
    b2 = jnp.zeros((NUM_CLASSES,), dtype=jnp.float32)

    out = gcn_forward(ahat, x, w1, b1, w2, b2)
    jax.block_until_ready(out)

    # Pure-JAX reference (unfolded math, per graph).
    def ref_one(a_g, x_g):
        h1 = jnp.maximum(a_g @ (x_g @ w1) + b1[None, :], 0.0)
        h2 = a_g @ (h1 @ w2) + b2[None, :]
        return jnp.mean(h2, axis=0)

    ref = jax.vmap(ref_one)(ahat, x)
    assert out.shape == (B, NUM_CLASSES)
    assert jnp.allclose(out, ref, atol=1e-4), (out, ref)

    print("KERNEL_OK")
</pallas_src>

<mosaic_0001>
module attributes {stable_mosaic.version = 11 : i64} {
  func.func @gcn_kernel(%arg0: i32, %arg1: memref<1x128x128xf32, #tpu.memory_space<vmem>>, %arg2: memref<1x128x128xf32, #tpu.memory_space<vmem>>, %arg3: memref<1x8x128xf32, #tpu.memory_space<vmem>>, %arg4: memref<128x128xf32, #tpu.memory_space<vmem>>, %arg5: memref<1x128xf32, #tpu.memory_space<vmem>>, %arg6: memref<128x128xf32, #tpu.memory_space<vmem>>, %arg7: memref<1x128xf32, #tpu.memory_space<vmem>>, %arg8: memref<1x8x128xf32, #tpu.memory_space<vmem>>) attributes {dimension_semantics = [#tpu.dimension_semantics<parallel>], iteration_bounds = array<i64: 8>, scalar_prefetch = 0 : i64, scratch_operands = 0 : i64, tpu.core_type = #tpu.core_type<tc>, window_params = [{transform_indices = @transform_0, window_bounds = array<i64: 1, 128, 128>}, {transform_indices = @transform_1, window_bounds = array<i64: 1, 128, 128>}, {transform_indices = @transform_2, window_bounds = array<i64: 1, 8, 128>}, {pipeline_mode = #tpu.pipeline_mode<synchronous>, transform_indices = @transform_3, window_bounds = array<i64: 128, 128>}, {pipeline_mode = #tpu.pipeline_mode<synchronous>, transform_indices = @transform_4, window_bounds = array<i64: 1, 128>}, {pipeline_mode = #tpu.pipeline_mode<synchronous>, transform_indices = @transform_5, window_bounds = array<i64: 128, 128>}, {pipeline_mode = #tpu.pipeline_mode<synchronous>, transform_indices = @transform_6, window_bounds = array<i64: 1, 128>}, {transform_indices = @transform_7, window_bounds = array<i64: 1, 8, 128>}]} {
    %c0 = arith.constant 0 : index
    %c0_0 = arith.constant 0 : index
    %c0_1 = arith.constant 0 : index
    %0 = vector.load %arg1[%c0, %c0_0, %c0_1] : memref<1x128x128xf32, #tpu.memory_space<vmem>>, vector<1x128x128xf32>
    %1 = vector.shape_cast %0 : vector<1x128x128xf32> to vector<128x128xf32>
    %c0_2 = arith.constant 0 : index
    %c0_3 = arith.constant 0 : index
    %c0_4 = arith.constant 0 : index
    %2 = vector.load %arg2[%c0_2, %c0_3, %c0_4] : memref<1x128x128xf32, #tpu.memory_space<vmem>>, vector<1x128x128xf32>
    %3 = vector.shape_cast %2 : vector<1x128x128xf32> to vector<128x128xf32>
    %c0_5 = arith.constant 0 : index
    %c0_6 = arith.constant 0 : index
    %4 = vector.load %arg4[%c0_5, %c0_6] : memref<128x128xf32, #tpu.memory_space<vmem>>, vector<128x128xf32>
    %cst = arith.constant dense<0.000000e+00> : vector<128x128xf32>
    %5 = tpu.matmul %3, %4, %cst {dimension_numbers = #tpu.dot_dimension_numbers<[1], [0], [0], [1], [0, 0, 1, 1], [], []>} : vector<128x128xf32>, vector<128x128xf32>, vector<128x128xf32> -> vector<128x128xf32>
    %cst_7 = arith.constant dense<0.000000e+00> : vector<128x128xf32>
    %6 = tpu.matmul %1, %5, %cst_7 {dimension_numbers = #tpu.dot_dimension_numbers<[1], [0], [0], [1], [0, 0, 1, 1], [], []>} : vector<128x128xf32>, vector<128x128xf32>, vector<128x128xf32> -> vector<128x128xf32>
    %c0_8 = arith.constant 0 : index
    %c0_9 = arith.constant 0 : index
    %7 = vector.load %arg5[%c0_8, %c0_9] : memref<1x128xf32, #tpu.memory_space<vmem>>, vector<1x128xf32>
    %8 = vector.broadcast %7 : vector<1x128xf32> to vector<128x128xf32>
    %9 = arith.addf %6, %8 : vector<128x128xf32>
    %cst_10 = arith.constant 0.000000e+00 : f32
    %10 = vector.broadcast %cst_10 : f32 to vector<128x128xf32>
    %11 = arith.maximumf %9, %10 : vector<128x128xf32>
    %c0_11 = arith.constant 0 : index
    %c0_12 = arith.constant 0 : index
    %c0_13 = arith.constant 0 : index
    %12 = vector.load %arg3[%c0_11, %c0_12, %c0_13] : memref<1x8x128xf32, #tpu.memory_space<vmem>>, vector<1x8x128xf32>
    %13 = vector.shape_cast %12 : vector<1x8x128xf32> to vector<8x128xf32>
    %cst_14 = arith.constant dense<0.000000e+00> : vector<8x128xf32>
    %14 = tpu.matmul %13, %11, %cst_14 {dimension_numbers = #tpu.dot_dimension_numbers<[1], [0], [0], [1], [0, 0, 1, 1], [], []>} : vector<8x128xf32>, vector<128x128xf32>, vector<8x128xf32> -> vector<8x128xf32>
    %c0_15 = arith.constant 0 : index
    %c0_16 = arith.constant 0 : index
    %15 = vector.load %arg6[%c0_15, %c0_16] : memref<128x128xf32, #tpu.memory_space<vmem>>, vector<128x128xf32>
    %cst_17 = arith.constant dense<0.000000e+00> : vector<8x128xf32>
    %16 = tpu.matmul %14, %15, %cst_17 {dimension_numbers = #tpu.dot_dimension_numbers<[1], [0], [0], [1], [0, 0, 1, 1], [], []>} : vector<8x128xf32>, vector<128x128xf32>, vector<8x128xf32> -> vector<8x128xf32>
    %c0_18 = arith.constant 0 : index
    %c0_19 = arith.constant 0 : index
    %17 = vector.load %arg7[%c0_18, %c0_19] : memref<1x128xf32, #tpu.memory_space<vmem>>, vector<1x128xf32>
    %18 = vector.broadcast %17 : vector<1x128xf32> to vector<8x128xf32>
    %19 = arith.addf %16, %18 : vector<8x128xf32>
    %c0_20 = arith.constant 0 : index
    %c0_21 = arith.constant 0 : index
    %c0_22 = arith.constant 0 : index
    %20 = vector.load %arg8[%c0_20, %c0_21, %c0_22] : memref<1x8x128xf32, #tpu.memory_space<vmem>>, vector<1x8x128xf32>
    %21 = vector.shape_cast %20 : vector<1x8x128xf32> to vector<8x128xf32>
    %22 = vector.shape_cast %19 : vector<8x128xf32> to vector<1x8x128xf32>
    tpu.vector_store %arg8[%c0_20, %c0_21, %c0_22], %22 {strides = array<i32>} : memref<1x8x128xf32, #tpu.memory_space<vmem>>, vector<1x8x128xf32>,
    return
  }
  func.func @transform_0(%arg0: i32) -> (i32, i32, i32) {
    %c0_i32 = arith.constant 0 : i32
    %c0_i32_0 = arith.constant 0 : i32
    %c0_i32_1 = arith.constant 0 : i32
    return %arg0, %c0_i32, %c0_i32_0 : i32, i32, i32
  }
  func.func @transform_1(%arg0: i32) -> (i32, i32, i32) {
    %c0_i32 = arith.constant 0 : i32
    %c0_i32_0 = arith.constant 0 : i32
    %c0_i32_1 = arith.constant 0 : i32
    return %arg0, %c0_i32, %c0_i32_0 : i32, i32, i32
  }
  func.func @transform_2(%arg0: i32) -> (i32, i32, i32) {
    %c0_i32 = arith.constant 0 : i32
    %c0_i32_0 = arith.constant 0 : i32
    %c0_i32_1 = arith.constant 0 : i32
    return %arg0, %c0_i32, %c0_i32_0 : i32, i32, i32
  }
  func.func @transform_3(%arg0: i32) -> (i32, i32) {
    %c0_i32 = arith.constant 0 : i32
    %c0_i32_0 = arith.constant 0 : i32
    %c0_i32_1 = arith.constant 0 : i32
    return %c0_i32, %c0_i32_0 : i32, i32
  }
  func.func @transform_4(%arg0: i32) -> (i32, i32) {
    %c0_i32 = arith.constant 0 : i32
    %c0_i32_0 = arith.constant 0 : i32
    %c0_i32_1 = arith.constant 0 : i32
    return %c0_i32, %c0_i32_0 : i32, i32
  }
  func.func @transform_5(%arg0: i32) -> (i32, i32) {
    %c0_i32 = arith.constant 0 : i32
    %c0_i32_0 = arith.constant 0 : i32
    %c0_i32_1 = arith.constant 0 : i32
    return %c0_i32, %c0_i32_0 : i32, i32
  }
  func.func @transform_6(%arg0: i32) -> (i32, i32) {
    %c0_i32 = arith.constant 0 : i32
    %c0_i32_0 = arith.constant 0 : i32
    %c0_i32_1 = arith.constant 0 : i32
    return %c0_i32, %c0_i32_0 : i32, i32
  }
  func.func @transform_7(%arg0: i32) -> (i32, i32, i32) {
    %c0_i32 = arith.constant 0 : i32
    %c0_i32_0 = arith.constant 0 : i32
    %c0_i32_1 = arith.constant 0 : i32
    return %arg0, %c0_i32, %c0_i32_0 : i32, i32, i32
  }
}

</mosaic_0001>

<bundles_post_ra>
// kernel: tpu_custom_call.1
= control target key start
LH: loop header
LB: loop body
LE: loop exit
PB: predicated region body
PF: predicated region fallthrough
CT: control target
= control target key end

     0   :  { %s2242_s0 = inlined_call_operand.hbm [shape: f32[8,128,128], index: 0, kind: input, shape index: {}]   ;;  %s2243_s1 = inlined_call_operand.hbm [shape: f32[8,128,128], index: 1, kind: input, shape index: {}]   ;;  %s2244_s2 = inlined_call_operand.hbm [shape: f32[8,8,128], index: 2, kind: input, shape index: {}]   ;;  %s2245_s3 = inlined_call_operand.hbm [shape: f32[128,128], index: 3, kind: input, shape index: {}]   ;;  %s2246_s4 = inlined_call_operand.vmem [shape: f32[1,128], index: 4, kind: input, shape index: {}]   ;;  %s2247_s5 = inlined_call_operand.hbm [shape: f32[128,128], index: 5, kind: input, shape index: {}]   ;;  %s2248_s6 = inlined_call_operand.vmem [shape: f32[1,128], index: 6, kind: input, shape index: {}]   ;;  %s2249_s7 = inlined_call_operand.hbm [shape: f32[8,8,128], index: 7, kind: output, shape index: {}]  }
   0x1   :  { %2268 = sst [smem:[#allocation20_spill]] %s2243_s1 }
   0x2   :  { %2269 = sst [smem:[#allocation21_spill]] %s2245_s3 }
   0x3   :  { %12 = vsyncpa [#allocation3], 0 }
   0x4   :  { %14 = vsyncpa [#allocation3 + $0x1], 0 }
   0x5   :  { %15 = vsyncpa [#allocation6], 0 }
   0x6   :  { %17 = vsyncpa [#allocation6 + $0x1], 0 }
   0x7   :  { %18 = vsyncpa [#allocation9], 0 }
   0x8   :  { %19 = vsyncpa [#allocation4], 0 }
   0x9   :  { %21 = vsyncpa [#allocation4 + $0x1], 0  ;;  %s1847_s24 = smov 0   ;;  %s1849_s25 = smov 0  }
   0xa   :  { %s1851_s26 = smov 0   ;;  %s1853_s27 = smov 0  }
   0xb LB: > { %2270 = sst [smem:[#allocation16_spill]] %s1790_s26  ;;  %s1868_s28 = sadd.s32 4294967295, %s1794_s27   ;;  %s1794_s27 = sphi %s1853_s27, %s2303_s27   ;;  %s1790_s26 = sphi %s1851_s26, %s2305_s26   ;;  %s1786_s25 = sphi %s1849_s25, %s2307_s25   ;;  %s1782_s24 = sphi %s1847_s24, %s2306_s24  }
   0xc   : > { %s1072_s29 = sadd.s32 4294967294, %s1794_s27   ;;  %s1872_s30 = sadd.s32 1, %s1794_s27  }
   0xd   : > { %2271 = sst [smem:[#allocation17_spill]] %s1872_s30  ;;  %s34_s8 = sadd.s32 1, %s1790_s26 }
   0xe   : > { %s31_s9 = ssub.s32 %s1794_s27, %s1872_s30  ;;  %p41_p0 = scmp.ne.s32.totalorder %s1790_s26, %s1786_s25 }
   0xf   : > { %p32_p1 = scmp.eq.s32.totalorder %s31_s9, 0  ;;  %p42_p2 = scmp.eq.s32.totalorder %s1794_s27, 0 }
  0x10   : > { %p47_p3 = scmp.ne.s32.totalorder %s1786_s25, %s1782_s24  ;;  %p2250_p4 = scmp.eq.s32.totalorder %s1868_s28, 0 }
  0x11   : > { %s1884_s10 = scalar_select %p32_p1, %s1790_s26, %s34_s8  }
  0x12   : > { %p1886_p5 = por %p42_p2, %p41_p0  ;;  %p1892_p6 = por %p2250_p4, %p47_p3 }
  0x13   : > { %2272 = sst [smem:[#allocation18_spill]] %s1884_s10  ;;  %p207_p7 = scmp.eq.s32.totalorder %s1868_s28, 7 }
  0x14   : > { %s2273_s11 = scalar_select %p1886_p5, 1, 0 }
  0x15   : > { %s2274_s12 = scalar_select %p1892_p6, 1, 0 }
  0x16   : > { %p213_p8 = scmp.eq.s32.totalorder %s1072_s29, 7  ;;  %p1073_p9 = scmp.ge.s32.totalorder %s1794_s27, 1 }
  0x17   : > { %p220_p10 = scmp.lt.s32.totalorder %s1794_s27, 9  ;;  %p1899_p11 = por %p207_p7, %p41_p0 }
  0x18   : > { %p1903_p12 = por %p213_p8, %p47_p3  ;;  %s1796_s16 = smov [#allocation8]  }
  0x19   : > { %s2275_s13 = scalar_select %p1899_p11, 1, 0 }
  0x1a   : > { %s2276_s14 = scalar_select %p1903_p12, 1, 0 }
  0x1b   : > { %p1907_p13 = pnand %p1073_p9, %p220_p10  ;;  %s232_s17 = sshll.u32 %s1796_s16, 4  ;;  %s233_s17 = int_to_ptr.vmem [resolvable:$true] %s232_s17 }
  0x1c   : > { %2277 = sst [smem:[#allocation19_spill]] %s2276_s14  ;;  %s1921_s19 = sand.u32 1, %s1790_s26  }
  0x1d   : > { %s2278_s15 = scalar_select %p1907_p13, 1, 0 }
  0x1e   : > { %p1508_p1 = pneg %p1907_p13  ;;  %s2280_s3 = sld [smem:[#allocation21_spill]] }
  0x20   : > { %p1915_p2 = pnand %p1508_p1, %p2250_p4 }
  0x22   : > { %s2279_s18 = scalar_select %p1915_p2, 1, 0 }
  0x23   : > { %p2260_p7 = pneg %p1915_p2 }
  0x24   : > { %s1574_s23 = scalar_lea.hbm %s2280_s3, 2048 }
  0x25   : > { %p1575_p3 = scmp.ne.s32.totalorder %s2280_s3, %s1574_s23  ;;  %p1581_p10 = scmp.lt.u32.totalorder %s1574_s23, %s2280_s3 }
  0x27   : > { %p1577_p8 = pnand %p2260_p7, %p1575_p3 }
  0x29   : > { %p1578_p9 = pneg %p1577_p8 }
  0x2b   : > { %p1583_p1 = pnand %p1581_p10, %p1578_p9 }
  0x2d   : > { %1586 = shalt.err (!%p1583_p1)
}
  0x2e   : > { %s1587_s20 = scalar_lea.vmem %s233_s17, 2048  ;;  %p1595_p11 = scmp.lt.s32.totalorder %s233_s17, %s233_s17 }
  0x2f   : > { %p1588_p4 = scmp.ne.s32.totalorder %s233_s17, %s1587_s20  ;;  %p1596_p6 = scmp.lt.s32.totalorder %s1587_s20, %s1587_s20 }
  0x31   : > { %p1590_p0 = pnand %p1588_p4, %p2260_p7  ;;  %p1597_p13 = por %p1596_p6, %p1595_p11 }
  0x33   : > { %p1591_p12 = pneg %p1590_p0 }
  0x35   : > { %p1598_p5 = pnand %p1597_p13, %p1591_p12 }
  0x37   : > { %1601 = shalt.err (!%p1598_p5)
}
  0x38   : > { %s2257_s21 = smov 128   ;;  %s1798_s22 = smov 8  }
  0x39   : > { %1511 = dma.hbm_to_vmem [thread:$0]  (!%p1915_p2), %s2280_s3, 2048, %s233_s17, [#allocation9], %s2257_s21, %s2257_s21, %s1798_s22  }
  0x3a   : > { %s2259_s20 = sshll.u32 %s1794_s27, 11  ;;  %p2281_p4 = scmp.ne.s32.totalorder %s2273_s11, 0 }
  0x3b   : > { %p2282_p5 = scmp.lt.s32.totalorder %s1794_s27, 8  ;;  %s286_s9 = sand.u32 1, %s1794_s27  }
  0x3c   : > { %s2284_s1 = sld [smem:[#allocation20_spill]]  ;;  %s2285_s30 = sshll.u32 %s1921_s19, 7 }
  0x3d   : > { %p1954_p6 = pnand %p2282_p5, %p2281_p4  ;;  %s290_s17 = scalar_lea.vmem [#allocation5], %s2285_s30 }
  0x3e   : > { %s297_s11 = sshll.u32 %s290_s17, 4  ;;  %s1970_s23 = scalar_lea.sflag [#allocation6], %s286_s9  ;;  %s1968_s11 = int_to_ptr.vmem [resolvable:$true] %s297_s11 }
  0x3f   : > { %s2283_s8 = scalar_select %p1954_p6, 1, 0 }
  0x40   : > { %p1976_p12 = pneg %p1954_p6 }
  0x42   : > { %s1964_s26 = scalar_lea.hbm %s2284_s1, %s2259_s20  ;;  %s1607_s30 = scalar_lea.hbm %s2284_s1, 16384 }
  0x43   : > { %s1602_s29 = scalar_lea.hbm %s1964_s26, 2048  ;;  %p1608_p3 = scmp.lt.u32.totalorder %s1964_s26, %s2284_s1 }
  0x44   : > { %p1603_p11 = scmp.ne.s32.totalorder %s1964_s26, %s1602_s29  ;;  %p1609_p8 = scmp.lt.u32.totalorder %s1607_s30, %s1602_s29 }
  0x45   : > { %s2286_s21 = scalar_select %p1976_p12, 1, 0 }
  0x46   : > { %p1605_p13 = pnand %p1976_p12, %p1603_p11  ;;  %p1610_p9 = por %p1609_p8, %p1608_p3 }
  0x47   : > { %p1611_p10 = scmp.lt.u32.totalorder %s1602_s29, %s1964_s26 }
  0x48   : > { %p1606_p0 = pneg %p1605_p13 }
  0x49   : > { %p1612_p1 = por %p1611_p10, %p1610_p9 }
  0x4b   : > { %p1613_p4 = pnand %p1612_p1, %p1606_p0 }
  0x4d   : > { %1616 = shalt.err (!%p1613_p4)
}
  0x4e   : > { %s1617_s9 = scalar_lea.vmem %s1968_s11, 2048  ;;  %s1799_s10 = smov [#allocation5]  }
  0x4f   : > { %p1618_p5 = scmp.ne.s32.totalorder %s1968_s11, %s1617_s9  ;;  %s1622_s16 = sshll.u32 %s1799_s10, 4  ;;  %s1623_s16 = int_to_ptr.vmem [resolvable:$false] %s1622_s16 }
  0x50   : > { %s1624_s20 = scalar_lea.vmem %s1623_s16, 4096  ;;  %p1625_p7 = scmp.lt.s32.totalorder %s1968_s11, %s1623_s16 }
  0x51   : > { %p1620_p11 = pnand %p1618_p5, %p1976_p12  ;;  %p1626_p2 = scmp.lt.s32.totalorder %s1624_s20, %s1617_s9 }
  0x53   : > { %p1621_p13 = pneg %p1620_p11  ;;  %p1627_p3 = por %p1626_p2, %p1625_p7 }
  0x55   : > { %p1628_p8 = pnand %p1627_p3, %p1621_p13 }
  0x57   : > { %1631 = shalt.err (!%p1628_p8)
}
  0x58   : > { %s2287_s29 = smov 128   ;;  %s1800_s30 = smov [#allocation10]  }
  0x59   : > { %1521 = dma.hbm_to_vmem [thread:$0]  (!%p1954_p6), %s1964_s26, 2048, %s1968_s11, %s1970_s23, %s2287_s29, %s2287_s29, %s1798_s22  }
  0x5a   : > { %s248_s17 = sshll.u32 %s1800_s30, 4  ;;  %s1632_s9 = scalar_lea.hbm %s2247_s5, 2048  ;;  %s249_s17 = int_to_ptr.vmem [resolvable:$true] %s248_s17 }
  0x5b   : > { %p1633_p2 = scmp.ne.s32.totalorder %s2247_s5, %s1632_s9  ;;  %p2288_p7 = scmp.ne.s32.totalorder %s2279_s18, 0 }
  0x5c   : > { %p1639_p1 = scmp.lt.u32.totalorder %s1632_s9, %s2247_s5 }
  0x5d   : > { %p2289_p0 = pneg %p2288_p7 }
  0x5f   : > { %p1635_p9 = pnand %p1633_p2, %p2289_p0 }
  0x61   : > { %p1636_p10 = pneg %p1635_p9 }
  0x63   : > { %p1641_p4 = pnand %p1639_p1, %p1636_p10 }
  0x65   : > { %1644 = shalt.err (!%p1641_p4)
}
  0x66   : > { %s1645_s26 = scalar_lea.vmem %s249_s17, 2048  ;;  %p2290_p11 = pmov %p2289_p0 }
  0x67   : > { %p1646_p5 = scmp.ne.s32.totalorder %s249_s17, %s1645_s26  ;;  %p1653_p8 = scmp.lt.s32.totalorder %s249_s17, %s249_s17 }
  0x68   : > { %p1654_p6 = scmp.lt.s32.totalorder %s1645_s26, %s1645_s26 }
  0x69   : > { %p1648_p13 = pnand %p1646_p5, %p2290_p11 }
  0x6a   : > { %p1655_p12 = por %p1654_p6, %p1653_p8 }
  0x6b   : > { %p1649_p3 = pneg %p1648_p13 }
  0x6d   : > { %p1656_p0 = pnand %p1655_p12, %p1649_p3 }
  0x6f   : > { %1659 = shalt.err (!%p1656_p0)
}
  0x70   : > { %1514 = dma.hbm_to_vmem [thread:$0]  (!%p2288_p7), %s2247_s5, 2048, %s249_s17, [#allocation9], %s2287_s29, %s2287_s29, %s1798_s22  }
  0x71   : > { %s2291_s14 = sshll.u32 %s1794_s27, 11  ;;  %s2292_s9 = sshll.u32 %s1921_s19, 7 }
  0x72   : > { %s2031_s10 = scalar_lea.hbm %s2242_s0, %s2291_s14  ;;  %s269_s18 = scalar_lea.vmem [#allocation2], %s2292_s9 }
  0x73   : > { %s276_s16 = sshll.u32 %s269_s18, 4  ;;  %s1083_s20 = sshll.u32 %s1921_s19, 3  ;;  %s2035_s16 = int_to_ptr.vmem [resolvable:$true] %s276_s16 }
  0x74   : > { %s266_s26 = scalar_lea.sflag [#allocation3], %s1921_s19  ;;  %s1660_s1 = scalar_lea.hbm %s2031_s10, 2048 }
  0x75   : > { %p1661_p6 = scmp.ne.s32.totalorder %s2031_s10, %s1660_s1  ;;  %p2293_p12 = scmp.ne.s32.totalorder %s2286_s21, 0 }
  0x76   : > { %s1665_s14 = scalar_lea.hbm %s2242_s0, 16384  ;;  %p1666_p9 = scmp.lt.u32.totalorder %s2031_s10, %s2242_s0 }
  0x77   : > { %p1663_p2 = pnand %p1661_p6, %p2293_p12  ;;  %p1667_p10 = scmp.lt.u32.totalorder %s1665_s14, %s1660_s1 }
  0x78   : > { %p1669_p4 = scmp.lt.u32.totalorder %s1660_s1, %s2031_s10 }
  0x79   : > { %p1664_p7 = pneg %p1663_p2  ;;  %p1668_p1 = por %p1667_p10, %p1666_p9 }
  0x7b   : > { %p1670_p5 = por %p1669_p4, %p1668_p1 }
  0x7d   : > { %p1671_p11 = pnand %p1670_p5, %p1664_p7 }
  0x7f   : > { %1674 = shalt.err (!%p1671_p11)
}
  0x80   : > { %s1675_s9 = scalar_lea.vmem %s2035_s16, 2048  ;;  %s1801_s18 = smov [#allocation2]  }
  0x81   : > { %p1676_p13 = scmp.ne.s32.totalorder %s2035_s16, %s1675_s9  ;;  %s1680_s17 = sshll.u32 %s1801_s18, 4  ;;  %s1681_s17 = int_to_ptr.vmem [resolvable:$false] %s1680_s17 }
  0x82   : > { %s1682_s3 = scalar_lea.vmem %s1681_s17, 4096  ;;  %p1683_p0 = scmp.lt.s32.totalorder %s2035_s16, %s1681_s17 }
  0x83   : > { %p1678_p3 = pnand %p1676_p13, %p2293_p12  ;;  %p1684_p6 = scmp.lt.s32.totalorder %s1682_s3, %s1675_s9 }
  0x85   : > { %p1679_p8 = pneg %p1678_p3  ;;  %p1685_p2 = por %p1684_p6, %p1683_p0 }
  0x87   : > { %p1686_p9 = pnand %p1685_p2, %p1679_p8 }
  0x89   : > { %1689 = shalt.err (!%p1686_p9)
}
  0x8a   : > { %p2294_p7 = scmp.ne.s32.totalorder %s2283_s8, 0  ;;  %s1084_s1 = sshll.u32 %s1794_s27, 7 }
  0x8b   : > { %s2069_s30 = scalar_lea.hbm %s2244_s2, %s1084_s1  ;;  %s311_s9 = scalar_lea.vmem [#allocation7], %s1083_s20 }
  0x8c   : > { %1518 = dma.hbm_to_vmem [thread:$0]  (!%p2294_p7), %s2031_s10, 2048, %s2035_s16, %s266_s26, %s2287_s29, %s2287_s29, %s1798_s22  }
  0x8d   : > { %s318_s18 = sshll.u32 %s311_s9, 4  ;;  %s1690_s17 = scalar_lea.hbm %s2069_s30, 128  ;;  %s319_s18 = int_to_ptr.vmem [resolvable:$true] %s318_s18 }
  0x8e   : > { %p1691_p10 = scmp.ne.s32.totalorder %s2069_s30, %s1690_s17  ;;  %s1695_s10 = scalar_lea.hbm %s2244_s2, 1024 }
  0x8f   : > { %p1696_p5 = scmp.lt.u32.totalorder %s2069_s30, %s2244_s2  ;;  %p1697_p11 = scmp.lt.u32.totalorder %s1695_s10, %s1690_s17 }
  0x90   : > { %p1693_p1 = pnand %p1691_p10, %p2293_p12  ;;  %p1699_p3 = scmp.lt.u32.totalorder %s1690_s17, %s2069_s30 }
  0x91   : > { %p1698_p13 = por %p1697_p11, %p1696_p5 }
  0x92   : > { %p1694_p4 = pneg %p1693_p1 }
  0x93   : > { %p1700_p8 = por %p1699_p3, %p1698_p13 }
  0x95   : > { %p1701_p0 = pnand %p1700_p8, %p1694_p4 }
  0x97   : > { %1704 = shalt.err (!%p1701_p0)
}
  0x98   : > { %s1705_s19 = scalar_lea.vmem %s319_s18, 128  ;;  %s1802_s20 = smov [#allocation7]  }
  0x99   : > { %p1706_p6 = scmp.ne.s32.totalorder %s319_s18, %s1705_s19  ;;  %s1710_s3 = sshll.u32 %s1802_s20, 4  ;;  %s1711_s3 = int_to_ptr.vmem [resolvable:$false] %s1710_s3 }
  0x9a   : > { %s1712_s1 = scalar_lea.vmem %s1711_s3, 256  ;;  %p1713_p10 = scmp.lt.s32.totalorder %s319_s18, %s1711_s3 }
  0x9b   : > { %p1708_p2 = pnand %p1706_p6, %p2293_p12  ;;  %p1714_p1 = scmp.lt.s32.totalorder %s1712_s1, %s1705_s19 }
  0x9d   : > { %p1709_p9 = pneg %p1708_p2  ;;  %p1715_p7 = por %p1714_p1, %p1713_p10 }
  0x9f   : > { %p1716_p5 = pnand %p1715_p7, %p1709_p9 }
  0xa1   : > { %1719 = shalt.err (!%p1716_p5)
}
  0xa2   : > { %p2295_p11 = scmp.ne.s32.totalorder %s2283_s8, 0  ;;  %p2296_p4 = scmp.ne.s32.totalorder %s2278_s15, 0 }
  0xa3   : > { %s2094_s21 = sand.u32 (!%p2296_p4), 1, %s1786_s25   ;;  %p2297_p12 = scmp.ne.s32.totalorder (!%p2296_p4), %s2274_s12, 0 }
  0xa4   : > { %1524 = dma.hbm_to_vmem [thread:$0]  (!%p2295_p11), %s2069_s30, 128, %s319_s18, %s1970_s23  }
  0xa5   : > { %327 = sbr.rel (%p2296_p4) target bundleno = 1151 (0x47f), region = 48  ;;  %s1086_s14 = sshll.u32 (!%p2296_p4), %s2094_s21, 7 }
  0xa6   : > { %s330_s11 = scalar_lea.sflag (!%p2296_p4), [#allocation3], %s2094_s21  ;;  %s2098_s9 = scalar_lea.vmem (!%p2296_p4), [#allocation2], %s1086_s14 }
  0xac   : > { %1765 = dma.done.wait (%p2297_p12), %s330_s11, 2048  }
  0xad   : > { %1767 = vsyncadd (%p2297_p12), %s330_s11, 4294965248  ;;  %s338_s8 = sand.u32 1, %s1868_s28   ;;  %s2105_s23 = scalar_lea.vmem [#allocation5], %s1086_s14 }
  0xae   : > { %s339_s15 = scalar_lea.sflag [#allocation6], %s338_s8 }
  0xaf   : > { %1769 = dma.done.wait (%p2297_p12), %s339_s15, 2176  }
  0xb0   : > { %1771 = vsyncadd (%p2297_p12), %s339_s15, 4294965120  ;;  %s1088_s30 = sshll.u32 %s2094_s21, 3  ;;  %p2298_p7 = scmp.eq.s32.totalorder %s1868_s28, 0 }
  0xb1   : > { %s2114_s18 = scalar_lea.vmem [#allocation7], %s1088_s30 }
  0xb2   : > { %1773 = dma.done.wait (%p2298_p7), [#allocation9], 4096   ;;  %p2299_p13 = pmov %p2298_p7 }
  0xb3   : > { %v432_v0 = vld [vmem:[#allocation8] sm:$0xff]  ;;  %v433_v1 = vld [vmem:[#allocation8 + $0x8] sm:$0xff]  ;;  %v434_v2 = vld [vmem:[#allocation8 + $0x10] sm:$0xff]  ;;  %vm1804_vm0 = vmmov 0   ;;  %s1095_s10 = sshll.u32 %s1868_s28, 7  ;;  %s399_s16 = scalar_lea.vmem [#allocation11], %s1088_s30 }
  0xb4   : > { %1775 = vsyncadd (%p2299_p13), [#allocation9], 4294963200  ;;  %v1380_v3 = vpack.c.bf16 %v433_v1, %v432_v0  ;;  %v435_v4 = vld [vmem:[#allocation8 + $0x18] sm:$0xff]  ;;  %v436_v6 = vld [vmem:[#allocation8 + $0x20] sm:$0xff]  ;;  %s940_s26 = sshll.u32 %s399_s16, 4  ;;  %s2199_s3 = scalar_lea.hbm %s2249_s7, %s1095_s10  ;;  %s2201_s26 = int_to_ptr.vmem [resolvable:$true] %s940_s26 }
  0xb5   : > { %v1384_v5 = vpack.c.bf16 %v435_v4, %v434_v2  ;;  %v437_v7 = vld [vmem:[#allocation8 + $0x28] sm:$0xff]  ;;  %v416_v9 = vld [vmem:[%s2105_s23] sm:$0xff]  ;;  %v439_v11 = vld [vmem:[#allocation8 + $0x38] sm:$0xff]  ;;  %s927_s1 = scalar_lea.sflag [#allocation4], %s2094_s21  ;;  %s1720_s14 = scalar_lea.vmem %s2201_s26, 128 }
  0xb6   : > { %1381 = vmatprep.subr.bf16.mxu0 %v1380_v3  ;;  %v1388_v8 = vpack.c.bf16 %v437_v7, %v436_v6  ;;  %v438_v10 = vld [vmem:[#allocation8 + $0x30] sm:$0xff]  ;;  %1230 = vmatprep.mubr.f32.mxu0 %v416_v9  ;;  %v440_v13 = vld [vmem:[#allocation8 + $0x40] sm:$0xff]  ;;  %v441_v14 = vld [vmem:[#allocation8 + $0x48] sm:$0xff]  ;;  %p1721_p3 = scmp.ne.s32.totalorder %s2201_s26, %s1720_s14  ;;  %p2300_p8 = scmp.ne.s32.totalorder %s2275_s13, 0 }
  0xb7   : > { %1383 = vmatpush3.bf16.msra.mxu0 %v1380_v3  ;;  %v1392_v12 = vpack.c.bf16 %v439_v11, %v438_v10  ;;  %v1396_v15 = vpack.c.bf16 %v441_v14, %v440_v13  ;;  %v442_v16 = vld [vmem:[#allocation8 + $0x50] sm:$0xff]  ;;  %v443_v17 = vld [vmem:[#allocation8 + $0x58] sm:$0xff]  ;;  %v444_v19 = vld [vmem:[#allocation8 + $0x60] sm:$0xff]  ;;  %s1806_s28 = smov [#allocation11]  }
  0xb8   : > { %1385 = vmatprep.subr.bf16.mxu0 %v1384_v5  ;;  %v1400_v18 = vpack.c.bf16 %v443_v17, %v442_v16  ;;  %v445_v20 = vld [vmem:[#allocation8 + $0x68] sm:$0xff]  ;;  %v446_v22 = vld [vmem:[#allocation8 + $0x70] sm:$0xff]  ;;  %v447_v23 = vld [vmem:[#allocation8 + $0x78] sm:$0xff]  ;;  %v1803_v16 = vmov 0.0|0.0   ;;  %v1805_v17 = vmov 0.0   ;;  %p1722_p0 = pnand %p1721_p3, %p2300_p8  ;;  %s1724_s11 = sshll.u32 %s1806_s28, 4  ;;  %s1725_s11 = int_to_ptr.vmem [resolvable:$false] %s1724_s11 }
  0xb9   : > { %v1404_v21 = vpack.c.bf16 %v445_v20, %v444_v19  ;;  %v1408_v24 = vpack.c.bf16 %v447_v23, %v446_v22  ;;  %v417_v25 = vld [vmem:[%s2105_s23 + $0x8] sm:$0xff]  ;;  %v418_v26 = vld [vmem:[%s2105_s23 + $0x10] sm:$0xff]  ;;  %v419_v27 = vld [vmem:[%s2105_s23 + $0x18] sm:$0xff]  ;;  %p1727_p2 = scmp.lt.s32.totalorder %s2201_s26, %s1725_s11 }
  0xba   : > { %v420_v28 = vld [vmem:[%s2105_s23 + $0x20] sm:$0xff]  ;;  %v421_v29 = vld [vmem:[%s2105_s23 + $0x28] sm:$0xff]  ;;  %v422_v30 = vld [vmem:[%s2105_s23 + $0x30] sm:$0xff]  ;;  %p1723_p6 = pneg %p1722_p0 }
  0xbb   : > { %1387 = vmatpush3.bf16.msra.mxu0 %v1384_v5  ;;  %v423_v31 = vld [vmem:[%s2105_s23 + $0x38] sm:$0xff]  ;;  %v424_v32 = vld [vmem:[%s2105_s23 + $0x40] sm:$0xff]  ;;  %v425_v33 = vld [vmem:[%s2105_s23 + $0x48] sm:$0xff] }
  0xbc   : > { %1389 = vmatprep.subr.bf16.mxu0 %v1388_v8  ;;  %v426_v34 = vld [vmem:[%s2105_s23 + $0x50] sm:$0xff]  ;;  %v427_v35 = vld [vmem:[%s2105_s23 + $0x58] sm:$0xff]  ;;  %v428_v36 = vld [vmem:[%s2105_s23 + $0x60] sm:$0xff] }
  0xbd   : > { %v429_v37 = vld [vmem:[%s2105_s23 + $0x68] sm:$0xff]  ;;  %v430_v38 = vld [vmem:[%s2105_s23 + $0x70] sm:$0xff]  ;;  %v431_v39 = vld [vmem:[%s2105_s23 + $0x78] sm:$0xff] }
  0xbe   : > { %v400_v40 = vld [vmem:[%s2098_s9] sm:$0xff]  ;;  %v401_v1 = vld [vmem:[%s2098_s9 + $0x8] sm:$0xff]  ;;  %v402_v2 = vld [vmem:[%s2098_s9 + $0x10] sm:$0xff] }
  0xbf   : > { %1391 = vmatpush3.bf16.msra.mxu0 %v1388_v8  ;;  %1286 = vmatprep.mubr.f32.mxu1 %v400_v40  ;;  %v403_v3 = vld [vmem:[%s2098_s9 + $0x18] sm:$0xff]  ;;  %v404_v4 = vld [vmem:[%s2098_s9 + $0x20] sm:$0xff]  ;;  %v405_v5 = vld [vmem:[%s2098_s9 + $0x28] sm:$0xff] }
  0xc0   : > { %1393 = vmatprep.subr.bf16.mxu0 %v1392_v12  ;;  %v406_v6 = vld [vmem:[%s2098_s9 + $0x30] sm:$0xff]  ;;  %v407_v7 = vld [vmem:[%s2098_s9 + $0x38] sm:$0xff]  ;;  %v408_v8 = vld [vmem:[%s2098_s9 + $0x40] sm:$0xff] }
  0xc1   : > { %v409_v9 = vld [vmem:[%s2098_s9 + $0x48] sm:$0xff]  ;;  %v410_v10 = vld [vmem:[%s2098_s9 + $0x50] sm:$0xff]  ;;  %v411_v11 = vld [vmem:[%s2098_s9 + $0x58] sm:$0xff] }
  0xc2   : > { %v413_v13 = vld [vmem:[%s2098_s9 + $0x68] sm:$0xff]  ;;  %v414_v14 = vld [vmem:[%s2098_s9 + $0x70] sm:$0xff]  ;;  %v833_v19 = vld [vmem:[#allocation10 + $0x8] sm:$0xff] }
  0xc3   : > { %1395 = vmatpush3.bf16.msra.mxu0 %v1392_v12  ;;  %v412_v12 = vld [vmem:[%s2098_s9 + $0x60] sm:$0xff]  ;;  %v835_v22 = vld [vmem:[#allocation10 + $0x18] sm:$0xff] }
  0xc4   : > { %1397 = vmatprep.subr.bf16.mxu0 %v1396_v15  ;;  %v834_v20 = vld [vmem:[#allocation10 + $0x10] sm:$0xff]  ;;  %v847_v40 = vld [vmem:[#allocation10 + $0x78] sm:$0xff] }
  0xc5   : > { %v1472_v23 = vpack.c.bf16 %v835_v22, %v834_v20 }
  0xc7   : > { %1399 = vmatpush3.bf16.msra.mxu0 %v1396_v15  ;;  %v415_v15 = vld [vmem:[%s2098_s9 + $0x78] sm:$0xff]  ;;  %s1726_s9 = scalar_lea.vmem %s1725_s11, 256 }
  0xc8   : > { %1401 = vmatprep.subr.bf16.mxu0 %v1400_v18  ;;  %p1728_p9 = scmp.lt.s32.totalorder %s1726_s9, %s1720_s14 }
  0xca   : > { %p1729_p10 = por %p1728_p9, %p1727_p2 }
  0xcb   : > { %1403 = vmatpush3.bf16.msra.mxu0 %v1400_v18  ;;  %v832_v18 = vld [vmem:[#allocation10] sm:$0xff] }
  0xcc   : > { %1405 = vmatprep.subr.bf16.mxu0 %v1404_v21  ;;  %p1730_p1 = pnand %p1729_p10, %p1723_p6 }
  0xcf   : > { %1407 = vmatpush3.bf16.msra.mxu0 %v1404_v21  ;;  %v1469_v21 = vpack.c.bf16 %v833_v19, %v832_v18 }
  0xd0   : > { %1409 = vmatprep.subr.bf16.mxu0 %v1408_v24 }
  0xd3   : > { %1411 = vmatpush3.bf16.msra.mxu0 %v1408_v24  ;;  %v836_v24 = vld [vmem:[#allocation10 + $0x20] sm:$0xff] }
  0xd4   : > { %1444 = vmatprep.subr.bf16.mxu0 %v1803_v16 }
  0xd6   : > { %1231 = vmatmul.mubr.f32.vlgmr.msra.gmra.mrb[0].mxu0 %v417_v25  ;;  %v837_v25 = vld [vmem:[#allocation10 + $0x28] sm:$0xff] }
  0xd7   : > { %1233 = vmatprep.mubr.f32.mxu0 %v418_v26  ;;  %v1475_v26 = vpack.c.bf16 %v837_v25, %v836_v24 }
  0xda   : > { %1234 = vmatmul.mubr.f32.gmra.mrb[2].mxu0 %v419_v27  ;;  %v838_v27 = vld [vmem:[#allocation10 + $0x30] sm:$0xff] }
  0xdb   : > { %1236 = vmatprep.mubr.f32.mxu0 %v420_v28  ;;  %v839_v28 = vld [vmem:[#allocation10 + $0x38] sm:$0xff] }
  0xde   : > { %1237 = vmatmul.mubr.f32.gmra.mrb[4].mxu0 %v421_v29  ;;  %v1478_v29 = vpack.c.bf16 %v839_v28, %v838_v27 }
  0xdf   : > { %1239 = vmatprep.mubr.f32.mxu0 %v422_v30  ;;  %v840_v30 = vld [vmem:[#allocation10 + $0x40] sm:$0xff] }
  0xe2   : > { %1240 = vmatmul.mubr.f32.gmra.mrb[6].mxu0 %v423_v31  ;;  %v841_v31 = vld [vmem:[#allocation10 + $0x48] sm:$0xff] }
  0xe3   : > { %1242 = vmatprep.mubr.f32.mxu0 %v424_v32  ;;  %v1481_v32 = vpack.c.bf16 %v841_v31, %v840_v30 }
  0xe6   : > { %1243 = vmatmul.mubr.f32.gmra.mrb[8].mxu0 %v425_v33  ;;  %v842_v33 = vld [vmem:[#allocation10 + $0x50] sm:$0xff] }
  0xe7   : > { %1245 = vmatprep.mubr.f32.mxu0 %v426_v34  ;;  %v843_v34 = vld [vmem:[#allocation10 + $0x58] sm:$0xff] }
  0xea   : > { %1246 = vmatmul.mubr.f32.gmra.mrb[10].mxu0 %v427_v35  ;;  %v1484_v35 = vpack.c.bf16 %v843_v34, %v842_v33 }
  0xeb   : > { %1248 = vmatprep.mubr.f32.mxu0 %v428_v36  ;;  %v844_v36 = vld [vmem:[#allocation10 + $0x60] sm:$0xff] }
  0xee   : > { %1249 = vmatmul.mubr.f32.gmra.mrb[12].mxu0 %v429_v37  ;;  %v845_v37 = vld [vmem:[#allocation10 + $0x68] sm:$0xff] }
  0xef   : > { %1251 = vmatprep.mubr.f32.mxu0 %v430_v38  ;;  %v1487_v38 = vpack.c.bf16 %v845_v37, %v844_v36  ;;  %v761_v36 = vld [vmem:[%s2114_s18] sm:$0xff] }
  0xf2   : > { %1252 = vmatmul.mubr.f32.gmra.mrb[14].mxu0 %v431_v39  ;;  %v846_v39 = vld [vmem:[#allocation10 + $0x70] sm:$0xff] }
  0xf3   : > { %1342 = vmatprep.mubr.msk.f32.mxu0 %vm1804_vm0, %v1805_v17 }
 0x1a9   : > { %v1232_v41 = vpop.f32.mrb[0].mxu0 }
 0x1aa   : > { %v514_v42 = vpop.f32.mrb[1].mxu0 }
 0x1ab   : > { %v1412_v43 = vpack.c.bf16 %v1232_v41, %v514_v42  ;;  %v1490_v41 = vpack.c.bf16 %v847_v40, %v846_v39  ;;  %v2164_v42 = vld [vmem:[%s2246_s4] ss:$0 sm:$0xff] }
 0x1ac   : > { %v1093_v39 = vld [vmem:[%s2248_s6] ss:$0 sm:$0xff] }
 0x1ad   : > { %v1235_v44 = vpop.f32.mrb[2].mxu0  ;;  %1413 = vmatprep.subr.bf16.mxu1 %v1412_v43 }
 0x1ae   : > { %v524_v45 = vpop.f32.mrb[3].mxu0  ;;  %1415 = vmatpush3.bf16.msra.mxu1 %v1412_v43 }
 0x1af   : > { %v1416_v46 = vpack.c.bf16 %v1235_v44, %v524_v45 }
 0x1b1   : > { %v1238_v47 = vpop.f32.mrb[4].mxu0  ;;  %1417 = vmatprep.subr.bf16.mxu1 %v1416_v46 }
 0x1b2   : > { %v534_v48 = vpop.f32.mrb[5].mxu0  ;;  %1419 = vmatpush3.bf16.msra.mxu1 %v1416_v46 }
 0x1b3   : > { %v1420_v49 = vpack.c.bf16 %v1238_v47, %v534_v48 }
 0x1b5   : > { %v1241_v50 = vpop.f32.mrb[6].mxu0  ;;  %1421 = vmatprep.subr.bf16.mxu1 %v1420_v49 }
 0x1b6   : > { %v544_v51 = vpop.f32.mrb[7].mxu0  ;;  %1423 = vmatpush3.bf16.msra.mxu1 %v1420_v49 }
 0x1b7   : > { %v1424_v52 = vpack.c.bf16 %v1241_v50, %v544_v51 }
 0x1b9   : > { %v1244_v53 = vpop.f32.mrb[8].mxu0  ;;  %1425 = vmatprep.subr.bf16.mxu1 %v1424_v52 }
 0x1ba   : > { %v554_v54 = vpop.f32.mrb[9].mxu0  ;;  %1427 = vmatpush3.bf16.msra.mxu1 %v1424_v52 }
 0x1bb   : > { %v1428_v55 = vpack.c.bf16 %v1244_v53, %v554_v54 }
 0x1bd   : > { %v1247_v56 = vpop.f32.mrb[10].mxu0  ;;  %1429 = vmatprep.subr.bf16.mxu1 %v1428_v55 }
 0x1be   : > { %v564_v57 = vpop.f32.mrb[11].mxu0  ;;  %1431 = vmatpush3.bf16.msra.mxu1 %v1428_v55 }
 0x1bf   : > { %v1432_v58 = vpack.c.bf16 %v1247_v56, %v564_v57 }
 0x1c1   : > { %v1250_v59 = vpop.f32.mrb[12].mxu0  ;;  %1433 = vmatprep.subr.bf16.mxu1 %v1432_v58 }
 0x1c2   : > { %v574_v60 = vpop.f32.mrb[13].mxu0  ;;  %1435 = vmatpush3.bf16.msra.mxu1 %v1432_v58 }
 0x1c3   : > { %v1436_v61 = vpack.c.bf16 %v1250_v59, %v574_v60 }
 0x1c5   : > { %v1253_v62 = vpop.f32.mrb[14].mxu0  ;;  %1437 = vmatprep.subr.bf16.mxu1 %v1436_v61 }
 0x1c6   : > { %v584_v63 = vpop.f32.mrb[15].mxu0  ;;  %1439 = vmatpush3.bf16.msra.mxu1 %v1436_v61 }
 0x1c7   : > { %v1440_v0 = vpack.c.bf16 %v1253_v62, %v584_v63 }
 0x1c9   : > { %1441 = vmatprep.subr.bf16.mxu1 %v1440_v0 }
 0x1ca   : > { %1443 = vmatpush3.bf16.msra.mxu1 %v1440_v0 }
 0x1cb   : > { %1468 = vmatprep.subr.bf16.mxu1 %v1803_v16 }
 0x1cd   : > { %1287 = vmatmul.mubr.f32.vlgmr.msra.gmra.mrb[0].mxu1 %v401_v1 }
 0x1ce   : > { %1289 = vmatprep.mubr.f32.mxu1 %v402_v2  ;;  %1470 = vmatpush3.bf16.msra.mxu1 %v1469_v21 }
 0x1cf   : > { %1471 = vmatprep.subr.bf16.mxu1 %v1803_v16 }
 0x1d1   : > { %1290 = vmatmul.mubr.f32.gmra.mrb[2].mxu1 %v403_v3 }
 0x1d2   : > { %1292 = vmatprep.mubr.f32.mxu1 %v404_v4  ;;  %1473 = vmatpush3.bf16.msra.mxu1 %v1472_v23 }
 0x1d3   : > { %1474 = vmatprep.subr.bf16.mxu1 %v1803_v16 }
 0x1d5   : > { %1293 = vmatmul.mubr.f32.gmra.mrb[4].mxu1 %v405_v5 }
 0x1d6   : > { %1295 = vmatprep.mubr.f32.mxu1 %v406_v6  ;;  %1476 = vmatpush3.bf16.msra.mxu1 %v1475_v26 }
 0x1d7   : > { %1477 = vmatprep.subr.bf16.mxu1 %v1803_v16 }
 0x1d9   : > { %1296 = vmatmul.mubr.f32.gmra.mrb[6].mxu1 %v407_v7 }
 0x1da   : > { %1298 = vmatprep.mubr.f32.mxu1 %v408_v8  ;;  %1479 = vmatpush3.bf16.msra.mxu1 %v1478_v29 }
 0x1db   : > { %1480 = vmatprep.subr.bf16.mxu1 %v1803_v16 }
 0x1dd   : > { %1299 = vmatmul.mubr.f32.gmra.mrb[8].mxu1 %v409_v9 }
 0x1de   : > { %1301 = vmatprep.mubr.f32.mxu1 %v410_v10  ;;  %1482 = vmatpush3.bf16.msra.mxu1 %v1481_v32 }
 0x1df   : > { %1483 = vmatprep.subr.bf16.mxu1 %v1803_v16 }
 0x1e1   : > { %1302 = vmatmul.mubr.f32.gmra.mrb[10].mxu1 %v411_v11 }
 0x1e2   : > { %1304 = vmatprep.mubr.f32.mxu1 %v412_v12  ;;  %1485 = vmatpush3.bf16.msra.mxu1 %v1484_v35 }
 0x1e3   : > { %1486 = vmatprep.subr.bf16.mxu1 %v1803_v16 }
 0x1e5   : > { %1305 = vmatmul.mubr.f32.gmra.mrb[12].mxu1 %v413_v13 }
 0x1e6   : > { %1307 = vmatprep.mubr.f32.mxu1 %v414_v14  ;;  %1488 = vmatpush3.bf16.msra.mxu1 %v1487_v38 }
 0x1e7   : > { %1489 = vmatprep.subr.bf16.mxu1 %v1803_v16 }
 0x1e9   : > { %1308 = vmatmul.mubr.f32.gmra.mrb[14].mxu1 %v415_v15 }
 0x1ea   : > { %1377 = vmatprep.mubr.msk.f32.mxu1 %vm1804_vm0, %v1805_v17  ;;  %1491 = vmatpush3.bf16.msra.mxu1 %v1490_v41 }
 0x2a0   : > { %v1288_v43 = vpop.f32.mrb[0].mxu1 }
 0x2a1   : > { %v672_v44 = vadd.f32 %v1288_v43, %v2164_v42  ;;  %v666_v45 = vpop.f32.mrb[1].mxu1 }
 0x2a2   : > { %v667_v46 = vadd.f32 %v2164_v42, %v666_v45 }
 0x2a3   : > { %v746_v47 = vmax.f32 %v672_v44, 0.0 }
 0x2a4   : > { %v745_v48 = vmax.f32 %v667_v46, 0.0  ;;  %v1291_v49 = vpop.f32.mrb[2].mxu1 }
 0x2a5   : > { %v682_v50 = vadd.f32 %v1291_v49, %v2164_v42  ;;  %v676_v51 = vpop.f32.mrb[3].mxu1 }
 0x2a6   : > { %v1445_v52 = vpack.c.bf16 %v746_v47, %v745_v48  ;;  %v677_v53 = vadd.f32 %v2164_v42, %v676_v51 }
 0x2a7   : > { %v748_v54 = vmax.f32 %v682_v50, 0.0 }
 0x2a8   : > { %v747_v55 = vmax.f32 %v677_v53, 0.0  ;;  %v1294_v56 = vpop.f32.mrb[4].mxu1  ;;  %1446 = vmatpush3.bf16.msra.mxu0 %v1445_v52 }
 0x2a9   : > { %v692_v57 = vadd.f32 %v1294_v56, %v2164_v42  ;;  %v686_v58 = vpop.f32.mrb[5].mxu1  ;;  %1447 = vmatprep.subr.bf16.mxu0 %v1803_v16 }
 0x2aa   : > { %v1448_v59 = vpack.c.bf16 %v748_v54, %v747_v55  ;;  %v687_v60 = vadd.f32 %v2164_v42, %v686_v58 }
 0x2ab   : > { %v750_v61 = vmax.f32 %v692_v57, 0.0 }
 0x2ac   : > { %v749_v62 = vmax.f32 %v687_v60, 0.0  ;;  %v1297_v63 = vpop.f32.mrb[6].mxu1  ;;  %1449 = vmatpush3.bf16.msra.mxu0 %v1448_v59 }
 0x2ad   : > { %v702_v0 = vadd.f32 %v1297_v63, %v2164_v42  ;;  %v696_v1 = vpop.f32.mrb[7].mxu1  ;;  %1450 = vmatprep.subr.bf16.mxu0 %v1803_v16 }
 0x2ae   : > { %v1451_v2 = vpack.c.bf16 %v750_v61, %v749_v62  ;;  %v697_v3 = vadd.f32 %v2164_v42, %v696_v1 }
 0x2af   : > { %v752_v4 = vmax.f32 %v702_v0, 0.0 }
 0x2b0   : > { %v751_v5 = vmax.f32 %v697_v3, 0.0  ;;  %v1300_v6 = vpop.f32.mrb[8].mxu1  ;;  %1452 = vmatpush3.bf16.msra.mxu0 %v1451_v2 }
 0x2b1   : > { %v712_v7 = vadd.f32 %v1300_v6, %v2164_v42  ;;  %v706_v8 = vpop.f32.mrb[9].mxu1  ;;  %1453 = vmatprep.subr.bf16.mxu0 %v1803_v16 }
 0x2b2   : > { %v1454_v9 = vpack.c.bf16 %v752_v4, %v751_v5  ;;  %v707_v10 = vadd.f32 %v2164_v42, %v706_v8 }
 0x2b3   : > { %v754_v11 = vmax.f32 %v712_v7, 0.0 }
 0x2b4   : > { %v753_v12 = vmax.f32 %v707_v10, 0.0  ;;  %v1303_v13 = vpop.f32.mrb[10].mxu1  ;;  %1455 = vmatpush3.bf16.msra.mxu0 %v1454_v9 }
 0x2b5   : > { %v722_v14 = vadd.f32 %v1303_v13, %v2164_v42  ;;  %v716_v15 = vpop.f32.mrb[11].mxu1  ;;  %1456 = vmatprep.subr.bf16.mxu0 %v1803_v16 }
 0x2b6   : > { %v1457_v17 = vpack.c.bf16 %v754_v11, %v753_v12  ;;  %v717_v18 = vadd.f32 %v2164_v42, %v716_v15 }
 0x2b7   : > { %v756_v19 = vmax.f32 %v722_v14, 0.0 }
 0x2b8   : > { %v755_v20 = vmax.f32 %v717_v18, 0.0  ;;  %v1306_v21 = vpop.f32.mrb[12].mxu1  ;;  %1458 = vmatpush3.bf16.msra.mxu0 %v1457_v17 }
 0x2b9   : > { %v732_v22 = vadd.f32 %v1306_v21, %v2164_v42  ;;  %v726_v23 = vpop.f32.mrb[13].mxu1  ;;  %1459 = vmatprep.subr.bf16.mxu0 %v1803_v16 }
 0x2ba   : > { %v1460_v24 = vpack.c.bf16 %v756_v19, %v755_v20  ;;  %v727_v25 = vadd.f32 %v2164_v42, %v726_v23 }
 0x2bb   : > { %v758_v26 = vmax.f32 %v732_v22, 0.0 }
 0x2bc   : > { %v757_v27 = vmax.f32 %v727_v25, 0.0  ;;  %v1309_v28 = vpop.f32.mrb[14].mxu1  ;;  %1461 = vmatpush3.bf16.msra.mxu0 %v1460_v24 }
 0x2bd   : > { %v742_v29 = vadd.f32 %v1309_v28, %v2164_v42  ;;  %v736_v30 = vpop.f32.mrb[15].mxu1  ;;  %1462 = vmatprep.subr.bf16.mxu0 %v1803_v16 }
 0x2be   : > { %v1463_v31 = vpack.c.bf16 %v758_v26, %v757_v27  ;;  %v737_v32 = vadd.f32 %v2164_v42, %v736_v30 }
 0x2bf   : > { %v760_v33 = vmax.f32 %v742_v29, 0.0 }
 0x2c0   : > { %v759_v34 = vmax.f32 %v737_v32, 0.0  ;;  %1464 = vmatpush3.bf16.msra.mxu0 %v1463_v31 }
 0x2c1   : > { %1465 = vmatprep.subr.bf16.mxu0 %v1803_v16 }
 0x2c2   : > { %v1466_v35 = vpack.c.bf16 %v760_v33, %v759_v34 }
 0x2c4   : > { %1467 = vmatpush3.bf16.msra.mxu0 %v1466_v35 }
 0x2c7   : > { %1343 = vmatmul.mubr.f32.vlgmr.msra.gmra.mrb[16].mxu0 %v761_v36 }
 0x39a   : > { %v828_v37 = vpop.f32.mrb[16].mxu0 }
 0x39b   : > { %v1344_v38 = vpop.f32.mrb[17].mxu0  ;;  %1378 = vmatmul.mubr.f32.vlgmr.msra.gmra.mrb[16].mxu1 %v828_v37 }
 0x46e   : > { %v921_v40 = vpop.f32.mrb[16].mxu1 }
 0x46f   : > { %v922_v41 = vadd.f32 %v1093_v39, %v921_v40  ;;  %v1379_v16 = vpop.f32.mrb[17].mxu1 }
 0x471   : > { %925 = vst [vmem:[%s399_s16] sm:$0xff] %v922_v41 }
 0x472   : > { %1733 = shalt.err (!%p1730_p1)
}
 0x473   : > { %s1734_s21 = scalar_lea.hbm %s2199_s3, 128  ;;  %s1738_s23 = scalar_lea.hbm %s2249_s7, 1024 }
 0x474   : > { %p1735_p5 = scmp.ne.s32.totalorder %s2199_s3, %s1734_s21  ;;  %p1739_p12 = scmp.lt.u32.totalorder %s2199_s3, %s2249_s7 }
 0x475   : > { %p1740_p7 = scmp.lt.u32.totalorder %s1738_s23, %s1734_s21  ;;  %p1742_p3 = scmp.lt.u32.totalorder %s1734_s21, %s2199_s3 }
 0x476   : > { %p1736_p11 = pnand %p1735_p5, %p2300_p8 }
 0x477   : > { %p1741_p13 = por %p1740_p7, %p1739_p12 }
 0x478   : > { %p1737_p4 = pneg %p1736_p11 }
 0x479   : > { %p1743_p0 = por %p1742_p3, %p1741_p13 }
 0x47b   : > { %p1744_p6 = pnand %p1743_p0, %p1737_p4 }
 0x47d   : > { %1747 = shalt.err (!%p1744_p6)
}
 0x47e   : > { %1506 = dma.vmem_to_hbm [thread:$0]  (%p2300_p8), %s2201_s26, 128, %s2199_s3, %s927_s1  }
 0x47f PF: > { %s2301_s12 = sld [smem:[#allocation19_spill]]  ;;  %p1534_p2 = scmp.ge.s32.totalorder %s1794_s27, 2 }
 0x480   : > { %s952_s17 = sand.u32 1, %s1782_s24  }
 0x481   : > { %s953_s22 = scalar_lea.sflag [#allocation4], %s952_s17 }
 0x485   : > { %p2302_p9 = scmp.ne.s32.totalorder %s2301_s12, 0 }
 0x487   : > { %p1526_p10 = pnand %p1534_p2, %p2302_p9 }
 0x489   : > { %1777 = dma.done.wait (!%p1526_p10), %s953_s22, 128  }
 0x48a   : > { %1779 = vsyncadd (!%p1526_p10), %s953_s22, 4294967168  ;;  %s2303_s27 = sld [smem:[#allocation17_spill]]  ;;  %s2304_s29 = sld [smem:[#allocation16_spill]] }
 0x48b   : > { %s2305_s26 = sld [smem:[#allocation18_spill]]  ;;  %s2306_s24 = smov %s1786_s25 }
 0x490   : > { %p24_p1 = scmp.ge.s32.totalorder %s2303_s27, 10   ;;  %s2307_s25 = smov %s2304_s29 }
 0x492   :  { %26 = sbr.rel (!%p24_p1) target bundleno = 11 (0xb), region = 125 }
 0x499   :  { %958 = vsyncpa [#allocation3], 1 }
 0x49a   :  { %960 = vsyncpa [#allocation3 + $0x1], 1 }
 0x49b   :  { %961 = vsyncpa [#allocation6], 1 }
 0x49c   :  { %963 = vsyncpa [#allocation6 + $0x1], 1 }
 0x49d   :  { %964 = vsyncpa [#allocation9], 1 }
 0x49e   :  { %965 = vsyncpa [#allocation4], 1 }
 0x49f   :  { %967 = vsyncpa [#allocation4 + $0x1], 1 }

</bundles_post_ra>
